<compile_context>
chip_gen: v6e
topology: v6e:2x2x1
jax: 0.10.0
libtpu: 0.0.40
codegen_flags: <defaults>
</compile_context>

<pallas_src>
import functools

import jax
import jax.numpy as jnp
from jax import lax
from jax.experimental import pallas as pl
from jax.experimental.pallas import tpu as pltpu

_NUM_SPLITS = 2            # v7x has 2 TensorCores; harmless (serial) on v5e / v6e.
_FAST_PATH_ELEMS = 65536   # below this, a fused XLA reduce beats a kernel launch.


def _jnp_forward(predictions, targets):
    """Pure-JAX mirror of the PyTorch forward (reference + small-problem fast path)."""
    c = predictions.shape[1]
    j = jnp.arange(c, dtype=jnp.int32)[None, :]
    modified = (j <= targets.astype(jnp.int32)[:, None]).astype(jnp.float32)
    diff = predictions.astype(jnp.float32) - modified
    return jnp.mean(jnp.sum(diff * diff, axis=1))


def _ordinal_loss_kernel(preds_ref, tgt_ref, out_ref, acc_ref, *,
                         n_total, tiles_per_split, num_splits):
    # preds_ref: (C, TN) input dtype     tgt_ref: (1, TN) int
    # out_ref:   (1, 1, 128) f32 per-split partial sum (value broadcast across lanes)
    # acc_ref:   (C, 1) f32 VMEM scratch, persists across the split's inner loop
    s = pl.program_id(0)
    i = pl.program_id(1)
    c, tn = preds_ref.shape

    @pl.when(i == 0)
    def _init():
        acc_ref[...] = jnp.zeros_like(acc_ref)

    g = s * tiles_per_split + i                 # global lane-tile id
    base = g * tn                               # first batch row covered by this tile

    preds = preds_ref[...].astype(jnp.float32)  # cast in-kernel (keep HBM traffic narrow)
    t = tgt_ref[...].astype(jnp.int32)          # (1, TN), int8/int32 widened here
    j = lax.broadcasted_iota(jnp.int32, (c, tn), 0)   # class index on sublanes
    modified = (j <= t).astype(jnp.float32)           # cumulative one-hot target
    diff = preds - modified
    sq = diff * diff                                   # (C, TN)

    def _accumulate(masked):
        val = sq
        if masked:
            lane = lax.broadcasted_iota(jnp.int32, (1, tn), 1)
            valid = (base + lane) < n_total            # mask batch padding / overflow
            val = jnp.where(valid, val, 0.0)
        acc_ref[...] += jnp.sum(val, axis=1, keepdims=True)   # lane fold -> (C, 1)

    if num_splits * tiles_per_split * tn == n_total:
        _accumulate(False)                     # static: no partial / overflow tiles exist
    else:
        @pl.when(base + tn <= n_total)         # full tiles: no masking work at all
        def _full():
            _accumulate(False)

        @pl.when(base + tn > n_total)          # last partial tile / overflow tile only
        def _partial():
            _accumulate(True)

    @pl.when(i == tiles_per_split - 1)
    def _finalize():
        total = jnp.sum(acc_ref[...])
        out_ref[...] = jnp.broadcast_to(total, out_ref.shape)


def ordinal_regression(predictions: jax.Array, targets: jax.Array,
                       *, tile_n: int = 65536, force_pallas: bool = False) -> jax.Array:
    """predictions: (N, C) float; targets: (N,) int with 0 <= t < C. Returns scalar f32."""
    n, c = predictions.shape

    if not force_pallas and n * c < _FAST_PATH_ELEMS:
        return _jnp_forward(predictions, targets)      # launch overhead would dominate

    if not jnp.issubdtype(targets.dtype, jnp.integer):
        targets = targets.astype(jnp.int32)

    # Lane-dense layout: classes on sublanes, batch on lanes. Keep the original dtypes.
    # TODO(synk): produce (C, N) upstream (or rely on allow_input_fusion below) so the
    # transpose never costs a separate HBM pass for very large N.
    preds_t = predictions.T                             # (C, N)
    tgt_row = targets.reshape(1, n)                     # (1, N), stored dtype (int8 ok)

    # Tile size: lane dim must be a multiple of 128 or the full extent; try to give every
    # split at least one tile of real work.
    if n <= 256:
        tn = n
    else:
        tn = min(int(tile_n), pl.cdiv(n, _NUM_SPLITS))
        tn = max(128, (tn // 128) * 128)

    total_tiles = pl.cdiv(n, tn)
    tiles_per_split = pl.cdiv(total_tiles, _NUM_SPLITS)
    grid = (_NUM_SPLITS, tiles_per_split)

    def in_map(s, i):
        g = s * tiles_per_split + i
        return (0, jnp.minimum(g, total_tiles - 1))     # clamp overflow tiles (masked away)

    kernel = functools.partial(
        _ordinal_loss_kernel, n_total=n,
        tiles_per_split=tiles_per_split, num_splits=_NUM_SPLITS)

    partials = pl.pallas_call(
        kernel,
        out_shape=jax.ShapeDtypeStruct((_NUM_SPLITS, 1, 128), jnp.float32),
        grid=grid,
        in_specs=[
            pl.BlockSpec((c, tn), in_map),              # predictions tile (C, TN)
            pl.BlockSpec((1, tn), in_map),              # targets tile (1, TN)
        ],
        out_specs=pl.BlockSpec((1, 1, 128), lambda s, i: (s, 0, 0)),
        scratch_shapes=[pltpu.VMEM((c, 1), jnp.float32)],   # tiny persistent accumulator
        compiler_params=pltpu.CompilerParams(
            dimension_semantics=("parallel", "arbitrary"),
            vmem_limit_bytes=32 * 1024 * 1024,
            allow_input_fusion=[True, True],
        ),
    )(preds_t, tgt_row)

    return jnp.sum(partials[:, 0, 0]) / jnp.float32(n)


if __name__ == "__main__":
    C = 6
    kp, kt, kp2, kt2 = jax.random.split(jax.random.PRNGKey(0), 4)

    # Tiny problem (N=8): checks the pure-jnp fast path AND the forced Pallas path
    # (single full-extent tile + one fully-masked overflow split).
    N = 8
    predictions = jax.random.normal(kp, (N, C), dtype=jnp.float32)
    targets = jax.random.randint(kt, (N,), 0, C, dtype=jnp.int32)
    ref = _jnp_forward(predictions, targets)

    loss_fast = ordinal_regression(predictions, targets)
    jax.block_until_ready(loss_fast)
    assert jnp.allclose(loss_fast, ref, rtol=1e-5, atol=1e-5), (loss_fast, ref)

    loss_kernel = ordinal_regression(predictions, targets, force_pallas=True)
    jax.block_until_ready(loss_kernel)
    assert jnp.allclose(loss_kernel, ref, rtol=1e-5, atol=1e-5), (loss_kernel, ref)

    # Multi-tile path: bf16 predictions, int8 targets, tail masking, 2-way split.
    N2 = 3000
    predictions2 = jax.random.normal(kp2, (N2, C), dtype=jnp.bfloat16)
    targets2 = jax.random.randint(kt2, (N2,), 0, C, dtype=jnp.int32).astype(jnp.int8)
    ref2 = _jnp_forward(predictions2, targets2)
    loss2 = ordinal_regression(predictions2, targets2, tile_n=512, force_pallas=True)
    jax.block_until_ready(loss2)
    assert jnp.allclose(loss2, ref2, rtol=1e-3, atol=1e-3), (loss2, ref2)

    print("KERNEL_OK")
</pallas_src>

<mosaic_0001>
module attributes {stable_mosaic.version = 11 : i64} {
  func.func @_ordinal_loss_kernel(%arg0: i32, %arg1: i32, %arg2: memref<6x8xf32, #tpu.memory_space<vmem>>, %arg3: memref<1x8xi32, #tpu.memory_space<vmem>>, %arg4: memref<1x1x128xf32, #tpu.memory_space<vmem>>, %arg5: memref<6x1xf32, #tpu.memory_space<vmem>>) attributes {dimension_semantics = [#tpu.dimension_semantics<parallel>, #tpu.dimension_semantics<arbitrary>], iteration_bounds = array<i64: 2, 1>, scalar_prefetch = 0 : i64, scratch_operands = 1 : i64, tpu.core_type = #tpu.core_type<tc>, window_params = [{transform_indices = @transform_0, window_bounds = array<i64: 6, 8>}, {transform_indices = @transform_1, window_bounds = array<i64: 1, 8>}, {transform_indices = @transform_2, window_bounds = array<i64: 1, 1, 128>}]} {
    %c0_i32 = arith.constant 0 : i32
    %0 = arith.cmpi eq, %arg1, %c0_i32 : i32
    %1 = arith.extui %0 : i1 to i32
    %c0_i32_0 = arith.constant 0 : i32
    %2 = arith.cmpi ne, %1, %c0_i32_0 : i32
    scf.if %2 {
      %cst = arith.constant 0.000000e+00 : f32
      %26 = vector.broadcast %cst : f32 to vector<6x1xf32>
      %c0_12 = arith.constant 0 : index
      %c0_13 = arith.constant 0 : index
      %27 = vector.load %arg5[%c0_12, %c0_13] : memref<6x1xf32, #tpu.memory_space<vmem>>, vector<6x1xf32>
      tpu.vector_store %arg5[%c0_12, %c0_13], %26 {strides = array<i32>} : memref<6x1xf32, #tpu.memory_space<vmem>>, vector<6x1xf32>,
    } else {
    }
    %c1_i32 = arith.constant 1 : i32
    %3 = arith.muli %arg0, %c1_i32 : i32
    %4 = arith.addi %3, %arg1 : i32
    %c8_i32 = arith.constant 8 : i32
    %5 = arith.muli %4, %c8_i32 : i32
    %c0 = arith.constant 0 : index
    %c0_1 = arith.constant 0 : index
    %6 = vector.load %arg2[%c0, %c0_1] : memref<6x8xf32, #tpu.memory_space<vmem>>, vector<6x8xf32>
    %c0_2 = arith.constant 0 : index
    %c0_3 = arith.constant 0 : index
    %7 = vector.load %arg3[%c0_2, %c0_3] : memref<1x8xi32, #tpu.memory_space<vmem>>, vector<1x8xi32>
    %8 = tpu.iota {dimensions = array<i32: 0>} : vector<6x8xi32>
    %9 = vector.broadcast %7 : vector<1x8xi32> to vector<6x8xi32>
    %10 = arith.cmpi sle, %8, %9 : vector<6x8xi32>
    %11 = arith.extui %10 : vector<6x8xi1> to vector<6x8xi32>
    %12 = arith.sitofp %11 : vector<6x8xi32> to vector<6x8xf32>
    %13 = arith.subf %6, %12 : vector<6x8xf32>
    %14 = arith.mulf %13, %13 : vector<6x8xf32>
    %c8_i32_4 = arith.constant 8 : i32
    %15 = arith.addi %5, %c8_i32_4 : i32
    %c8_i32_5 = arith.constant 8 : i32
    %16 = arith.cmpi sle, %15, %c8_i32_5 : i32
    %17 = arith.extui %16 : i1 to i32
    %c0_i32_6 = arith.constant 0 : i32
    %18 = arith.cmpi ne, %17, %c0_i32_6 : i32
    scf.if %18 {
      %c0_12 = arith.constant 0 : index
      %c0_13 = arith.constant 0 : index
      %26 = vector.load %arg5[%c0_12, %c0_13] : memref<6x1xf32, #tpu.memory_space<vmem>>, vector<6x1xf32>
      %cst = arith.constant dense<0.000000e+00> : vector<6xf32>
      %27 = vector.multi_reduction <add>, %14, %cst [1] : vector<6x8xf32> to vector<6xf32>
      %28 = vector.shape_cast %27 : vector<6xf32> to vector<6x1xf32>
      %29 = arith.addf %26, %28 : vector<6x1xf32>
      %c0_14 = arith.constant 0 : index
      %c0_15 = arith.constant 0 : index
      %30 = vector.load %arg5[%c0_14, %c0_15] : memref<6x1xf32, #tpu.memory_space<vmem>>, vector<6x1xf32>
      tpu.vector_store %arg5[%c0_14, %c0_15], %29 {strides = array<i32>} : memref<6x1xf32, #tpu.memory_space<vmem>>, vector<6x1xf32>,
    } else {
    }
    %c8_i32_7 = arith.constant 8 : i32
    %19 = arith.addi %5, %c8_i32_7 : i32
    %c8_i32_8 = arith.constant 8 : i32
    %20 = arith.cmpi sgt, %19, %c8_i32_8 : i32
    %21 = arith.extui %20 : i1 to i32
    %c0_i32_9 = arith.constant 0 : i32
    %22 = arith.cmpi ne, %21, %c0_i32_9 : i32
    scf.if %22 {
      %26 = tpu.iota {dimensions = array<i32: 1>} : vector<1x8xi32>
      %27 = vector.broadcast %5 : i32 to vector<1x8xi32>
      %28 = arith.addi %27, %26 : vector<1x8xi32>
      %c8_i32_12 = arith.constant 8 : i32
      %29 = vector.broadcast %c8_i32_12 : i32 to vector<1x8xi32>
      %30 = arith.cmpi slt, %28, %29 : vector<1x8xi32>
      %cst = arith.constant 0.000000e+00 : f32
      %31 = vector.shape_cast %30 : vector<1x8xi1> to vector<1x8xi1>
      %32 = vector.broadcast %31 : vector<1x8xi1> to vector<6x8xi1>
      %33 = vector.broadcast %cst : f32 to vector<6x8xf32>
      %34 = arith.select %32, %14, %33 : vector<6x8xi1>, vector<6x8xf32>
      %c0_13 = arith.constant 0 : index
      %c0_14 = arith.constant 0 : index
      %35 = vector.load %arg5[%c0_13, %c0_14] : memref<6x1xf32, #tpu.memory_space<vmem>>, vector<6x1xf32>
      %cst_15 = arith.constant dense<0.000000e+00> : vector<6xf32>
      %36 = vector.multi_reduction <add>, %34, %cst_15 [1] : vector<6x8xf32> to vector<6xf32>
      %37 = vector.shape_cast %36 : vector<6xf32> to vector<6x1xf32>
      %38 = arith.addf %35, %37 : vector<6x1xf32>
      %c0_16 = arith.constant 0 : index
      %c0_17 = arith.constant 0 : index
      %39 = vector.load %arg5[%c0_16, %c0_17] : memref<6x1xf32, #tpu.memory_space<vmem>>, vector<6x1xf32>
      tpu.vector_store %arg5[%c0_16, %c0_17], %38 {strides = array<i32>} : memref<6x1xf32, #tpu.memory_space<vmem>>, vector<6x1xf32>,
    } else {
    }
    %c0_i32_10 = arith.constant 0 : i32
    %23 = arith.cmpi eq, %arg1, %c0_i32_10 : i32
    %24 = arith.extui %23 : i1 to i32
    %c0_i32_11 = arith.constant 0 : i32
    %25 = arith.cmpi ne, %24, %c0_i32_11 : i32
    scf.if %25 {
      %c0_12 = arith.constant 0 : index
      %c0_13 = arith.constant 0 : index
      %26 = vector.load %arg5[%c0_12, %c0_13] : memref<6x1xf32, #tpu.memory_space<vmem>>, vector<6x1xf32>
      %27 = vector.shape_cast %26 : vector<6x1xf32> to vector<1x6x1xf32>
      %cst = arith.constant dense<0.000000e+00> : vector<1xf32>
      %28 = vector.multi_reduction <add>, %27, %cst [1, 2] : vector<1x6x1xf32> to vector<1xf32>
      %29 = vector.shape_cast %28 : vector<1xf32> to vector<1x1x1xf32>
      %30 = vector.extract %29[0, 0, 0] : f32 from vector<1x1x1xf32>
      %31 = vector.broadcast %30 : f32 to vector<1x1x128xf32>
      %c0_14 = arith.constant 0 : index
      %c0_15 = arith.constant 0 : index
      %c0_16 = arith.constant 0 : index
      %32 = vector.load %arg4[%c0_14, %c0_15, %c0_16] : memref<1x1x128xf32, #tpu.memory_space<vmem>>, vector<1x1x128xf32>
      tpu.vector_store %arg4[%c0_14, %c0_15, %c0_16], %31 {strides = array<i32>} : memref<1x1x128xf32, #tpu.memory_space<vmem>>, vector<1x1x128xf32>,
    } else {
    }
    return
  }
  func.func @transform_0(%arg0: i32, %arg1: i32) -> (i32, i32) {
    %c1_i32 = arith.constant 1 : i32
    %0 = arith.muli %arg0, %c1_i32 : i32
    %1 = arith.addi %0, %arg1 : i32
    %c0_i32 = arith.constant 0 : i32
    %2 = arith.minsi %1, %c0_i32 : i32
    %c0_i32_0 = arith.constant 0 : i32
    %c0_i32_1 = arith.constant 0 : i32
    return %c0_i32_0, %2 : i32, i32
  }
  func.func @transform_1(%arg0: i32, %arg1: i32) -> (i32, i32) {
    %c1_i32 = arith.constant 1 : i32
    %0 = arith.muli %arg0, %c1_i32 : i32
    %1 = arith.addi %0, %arg1 : i32
    %c0_i32 = arith.constant 0 : i32
    %2 = arith.minsi %1, %c0_i32 : i32
    %c0_i32_0 = arith.constant 0 : i32
    %c0_i32_1 = arith.constant 0 : i32
    return %c0_i32_0, %2 : i32, i32
  }
  func.func @transform_2(%arg0: i32, %arg1: i32) -> (i32, i32, i32) {
    %c0_i32 = arith.constant 0 : i32
    %c0_i32_0 = arith.constant 0 : i32
    %c0_i32_1 = arith.constant 0 : i32
    return %arg0, %c0_i32, %c0_i32_0 : i32, i32, i32
  }
}

</mosaic_0001>

<bundles_post_ra>
// kernel: tpu_custom_call.1
= control target key start
LH: loop header
LB: loop body
LE: loop exit
PB: predicated region body
PF: predicated region fallthrough
CT: control target
= control target key end

     0   :  { %7 = vsyncpa [#allocation4], 0  ;;  %s814_s0 = inlined_call_operand.hbm [shape: f32[6,8], index: 0, kind: input, shape index: {}]   ;;  %s815_s1 = inlined_call_operand.vmem [shape: s32[1,8], index: 1, kind: input, shape index: {}]   ;;  %s816_s2 = inlined_call_operand.hbm [shape: f32[2,1,128], index: 2, kind: output, shape index: {}]  }
   0x1   :  { %9 = vsyncpa [#allocation4 + $0x1], 0 }
   0x2   :  { %10 = vsyncpa [#allocation5], 0 }
   0x3   :  { %12 = vsyncpa [#allocation5 + $0x1], 0  ;;  %s641_s9 = smov 0   ;;  %s643_s10 = smov 0  }
   0x4   :  { %s645_s11 = smov 0   ;;  %s647_s12 = smov 0  }
   0x5   :  { %s649_s13 = smov 0   ;;  %s651_s14 = smov 0  }
   0x6   :  { %s653_s15 = smov 0   ;;  %s655_s16 = smov 0  }
   0x7 LB: > { %s384_s17 = sadd.s32 4294967295, %s621_s16   ;;  %s385_s18 = sadd.s32 4294967294, %s621_s16   ;;  %s621_s16 = sphi %s655_s16, %s18_s16   ;;  %s617_s15 = sphi %s653_s15, %s835_s15   ;;  %s613_s14 = sphi %s651_s14, %s834_s14   ;;  %s609_s13 = sphi %s649_s13, %s804_s13   ;;  %s605_s12 = sphi %s647_s12, %s833_s12   ;;  %s601_s11 = sphi %s645_s11, %s832_s11   ;;  %s597_s10 = sphi %s643_s10, %s831_s10   ;;  %s593_s9 = sphi %s641_s9, %s830_s9  }
   0x8   : > { %s30_s19 = sadd.s32 1, %s617_s15  ;;  %p590_p1 = scmp.ne.s32.totalorder %s609_s13, 0 }
   0x9   : > { %p32_p0 = scmp.ge.s32.totalorder %s30_s19, 2  ;;  %p51_p2 = scmp.eq.s32.totalorder %s621_s16, 0 }
   0xa   : > { %p56_p3 = scmp.ne.s32.totalorder %s609_s13, %s605_s12  ;;  %p57_p5 = scmp.eq.s32.totalorder %s384_s17, 0 }
   0xb   : > { %s837_s19 = smov (%p32_p0, %s30_s19), 0  ;;  %p687_p4 = por %p590_p1, %p51_p2 }
   0xc   : > { %p691_p6 = por %p57_p5, %p56_p3  ;;  %s98_s22 = ssub.s32 %s617_s15, %s837_s19 }
   0xd   : > { %p99_p7 = scmp.eq.s32.totalorder %s98_s22, 0  ;;  %s101_s23 = sadd.s32 1, %s601_s11 }
   0xe   : > { %s820_s21 = scalar_select %p691_p6, 1, 0 }
   0xf   : > { %s699_s24 = scalar_select %p99_p7, %s601_s11, %s101_s23  }
  0x10   : > { %p111_p8 = scmp.ne.s32.totalorder %s601_s11, %s597_s10  ;;  %p112_p9 = scmp.eq.s32.totalorder %s384_s17, 1 }
  0x11   : > { %p117_p10 = scmp.ne.s32.totalorder %s597_s10, %s593_s9  ;;  %p118_p11 = scmp.eq.s32.totalorder %s385_s18, 1 }
  0x12   : > { %p705_p12 = por %p112_p9, %p111_p8  ;;  %p417_p1 = scmp.lt.s32.totalorder %s621_s16, 2 }
  0x13   : > { %p710_p0 = por %p118_p11, %p117_p10  ;;  %s623_s27 = smov [#allocation3]  }
  0x14   : > { %s821_s25 = scalar_select %p705_p12, 1, 0 }
  0x15   : > { %s822_s26 = scalar_select %p710_p0, 1, 0 }
  0x16   : > { %s152_s28 = sshll.u32 %s623_s27, 4  ;;  %p717_p2 = pnand %p417_p1, %p687_p4  ;;  %s153_s28 = int_to_ptr.vmem [resolvable:$true] %s152_s28 }
  0x17   : > { %s492_s4 = scalar_lea.hbm %s814_s0, 128 }
  0x18   : > { %p493_p7 = scmp.ne.s32.totalorder %s814_s0, %s492_s4  ;;  %p494_p8 = pneg %p717_p2 }
  0x19   : > { %p499_p4 = scmp.lt.s32.totalorder %s492_s4, %s492_s4 }
  0x1a   : > { %p495_p9 = pnand %p494_p8, %p493_p7 }
  0x1c   : > { %p496_p10 = pneg %p495_p9 }
  0x1e   : > { %p501_p11 = pnand %p499_p4, %p496_p10 }
  0x20   : > { %504 = shalt.err (!%p501_p11)
}
  0x21   : > { %s505_s7 = scalar_lea.vmem %s153_s28, 128  ;;  %s512_s8 = scalar_lea.vmem %s153_s28, 256 }
  0x22   : > { %p506_p1 = scmp.ne.s32.totalorder %s153_s28, %s505_s7  ;;  %p513_p5 = scmp.lt.s32.totalorder %s153_s28, %s153_s28 }
  0x23   : > { %p514_p0 = scmp.lt.s32.totalorder %s512_s8, %s505_s7 }
  0x24   : > { %p508_p13 = pnand %p506_p1, %p494_p8 }
  0x25   : > { %p515_p12 = por %p514_p0, %p513_p5 }
  0x26   : > { %p509_p3 = pneg %p508_p13 }
  0x28   : > { %p516_p6 = pnand %p515_p12, %p509_p3 }
  0x2a   : > { %519 = shalt.err (!%p516_p6)
}
  0x2b   : > { %412 = dma.hbm_to_vmem [thread:$0]  (!%p717_p2), %s814_s0, 128, %s153_s28, [#allocation4]  }
  0x2c   : > { %p824_p7 = scmp.lt.s32.totalorder %s621_s16, 3  ;;  %p825_p9 = scmp.ge.s32.totalorder %s621_s16, 1 }
  0x2e   : > { %p170_p10 = pnand %p825_p9, %p824_p7 }
  0x2f   : > { %s175_s18 = sand.u32 (!%p170_p10), 1, %s609_s13   ;;  %p826_p12 = scmp.ne.s32.totalorder (!%p170_p10), %s820_s21, 0 }
  0x30   : > { %173 = sbr.rel (%p170_p10) target bundleno = 586 (0x24a), region = 28  ;;  %s391_s20 = sshll.u32 (!%p170_p10), %s175_s18, 3 }
  0x31   : > { %s176_s22 = scalar_lea.sflag (!%p170_p10), [#allocation4], %s175_s18  ;;  %s179_s23 = scalar_lea.vmem (!%p170_p10), [#allocation3], %s391_s20 }
  0x35   : > { %583 = dma.done.wait (%p826_p12), %s176_s22, 128  }
  0x36   : > { %585 = vsyncadd (%p826_p12), %s176_s22, 4294967168  ;;  %s203_s27 = sand.u32 1, %s597_s10   ;;  %p209_p6 = scmp.lt.s32.totalorder %s613_s14, 0  ;;  %vm221_vm0 = vcmask 5120   ;;  %v227_v0 = vlaneseq  ;;  %v624_v1 = vmov 0.0  }
  0x37   : > { %222 = vst.msk [vmem:[#allocation2] sm:$0x3f] %vm221_vm0, %v624_v1  ;;  %s395_s28 = sshll.u32 %s613_s14, 3  ;;  %v225_v3 = vld [vmem:[%s179_s23] sm:$0x3f]  ;;  %s755_s5 = scalar_lea.vmem [#allocation6], %s203_s27 }
  0x38   : > { %s210_s29 = scalar_select %p209_p6, %s613_s14, 0  ;;  %v228_v2 = vshrl.u32 %v227_v0, 7 }
  0x39   : > { %s238_s30 = sadd.s32 8, %s395_s28 }
  0x3a   : > { %s839_s29 = smov (!%p209_p6, %s210_s29), 0  ;;  %p398_p13 = scmp.gt.s32.totalorder %s238_s30, 8 }
  0x3b   : > { %s213_s4 = scalar_lea.vmem %s815_s1, %s839_s29 }
  0x3c   : > { %v396_v4 = vld [vmem:[%s213_s4] ss:$0 sm:$0xff] }
  0x3d   : > { %vm233_vm1 = vcmp.le.s32.totalorder %v228_v2, %v396_v4  ;;  %242 = sbr.rel (%p398_p13) target bundleno = 209 (0xd1), region = 40 }
  0x3e   : > { %v397_v5 = vsel %vm233_vm1, 1.0, %v624_v1 }
  0x3f   : > { %v236_v6 = vsub.f32 %v225_v3, %v397_v5 }
  0x41   : > { %v237_v7 = vmul.f32 %v236_v6, %v236_v6 }
  0x42   : > { %vm244_vm2 = vcmask 62464   ;;  %v243_v9 = vld [vmem:[#allocation2] sm:$0x3f] }
  0x43   : > { %v245_v8 = vsel %vm244_vm2, %v237_v7, 0.0 }
  0x44   : > { %246 = vadd.xlane.f32.xlu0 %v245_v8 }
  0xcd   : > { %v247_v10 = vpop.xlane.xlu0 %246 }
  0xce   : > { %v248_v11 = vadd.f32 %v247_v10, %v243_v9 }
  0xd0   : > { %250 = vst.msk [vmem:[#allocation2] sm:$0x3f] %vm221_vm0, %v248_v11 }
  0xd1 PF: > { %p399_p0 = scmp.le.s32.totalorder %s238_s30, 8 }
  0xd3   : > { %254 = sbr.rel (%p399_p0) target bundleno = 364 (0x16c), region = 44 }
  0xd8   : > { %v256_v12 = vand.u32 127, %v227_v0  ;;  %v257_v13 = vstv %s395_s28  ;;  %vm264_vm3 = vcmask 62464   ;;  %v263_v17 = vld [vmem:[#allocation2] sm:$0x3f] }
  0xda   : > { %v258_v14 = vadd.s32 %v257_v13, %v256_v12 }
  0xdc   : > { %vm259_vm4 = vcmp.lt.s32.totalorder %v258_v14, 8 }
  0xdd   : > { %v262_v15 = vsel %vm259_vm4, %v237_v7, 0.0 }
  0xde   : > { %v265_v16 = vsel %vm264_vm3, %v262_v15, 0.0 }
  0xdf   : > { %266 = vadd.xlane.f32.xlu0 %v265_v16 }
 0x168   : > { %v267_v18 = vpop.xlane.xlu0 %266 }
 0x169   : > { %v268_v19 = vadd.f32 %v267_v18, %v263_v17 }
 0x16b   : > { %270 = vst.msk [vmem:[#allocation2] sm:$0x3f] %vm221_vm0, %v268_v19 }
 0x16c PF: > { %s400_s6 = sshll.u32 %s613_s14, 4  ;;  %s301_s7 = sshll.u32 %s755_s5, 4  ;;  %s302_s7 = int_to_ptr.vmem [resolvable:$true] %s301_s7 }
 0x16d   : > { %s765_s17 = scalar_lea.hbm %s816_s2, %s400_s6  ;;  %s289_s20 = scalar_lea.sflag [#allocation5], %s203_s27 }
 0x16e   : > { %s520_s22 = scalar_lea.vmem %s302_s7, 16  ;;  %p827_p3 = scmp.ne.s32.totalorder %s821_s25, 0 }
 0x16f   : > { %p521_p2 = scmp.ne.s32.totalorder %s302_s7, %s520_s22  ;;  %s625_s23 = smov [#allocation6]  }
 0x170   : > { %s524_s28 = sshll.u32 %s625_s23, 4  ;;  %s525_s28 = int_to_ptr.vmem [resolvable:$false] %s524_s28 }
 0x171   : > { %p522_p5 = pnand %p521_p2, %p827_p3  ;;  %s526_s14 = scalar_lea.vmem %s525_s28, 32 }
 0x172   : > { %v274_v20 = vld [vmem:[#allocation2] sm:$0x3f]  ;;  %p527_p4 = scmp.lt.s32.totalorder %s302_s7, %s525_s28  ;;  %p528_p11 = scmp.lt.s32.totalorder %s526_s14, %s520_s22 }
 0x173   : > { %v276_v21 = vsel %vm221_vm0, %v274_v20, 0.0  ;;  %p523_p8 = pneg %p522_p5 }
 0x174   : > { %277 = vadd.xlane.f32.xlu0 %v276_v21  ;;  %p529_p1 = por %p528_p11, %p527_p4 }
 0x176   : > { %p530_p7 = pnand %p529_p1, %p523_p8 }
 0x1fd   : > { %v278_v22 = vpop.xlane.xlu0 %277 }
 0x1fe   : > { %v279_v23 = vrot.slane %v278_v22, 4 }
 0x200   : > { %v280_v24 = vadd.f32 %v279_v23, %v278_v22 }
 0x202   : > { %v281_v25 = vrot.slane %v280_v24, 2 }
 0x204   : > { %v282_v26 = vadd.f32 %v281_v25, %v280_v24 }
 0x206   : > { %v283_v27 = vrot.slane %v282_v26, 1 }
 0x208   : > { %v284_v28 = vadd.f32 %v283_v27, %v282_v26 }
 0x20a   : > { %403 = vpush %v284_v28 }
 0x23b   : > { %s404_s18 = spop %403 }
 0x23c   : > { %v286_v29 = vstv %s404_s18 }
 0x23d   : > { %287 = vst [vmem:[%s755_s5] sm:$0x1] %v286_v29 }
 0x23e   : > { %533 = shalt.err (!%p530_p7)
}
 0x23f   : > { %s534_s29 = scalar_lea.hbm %s765_s17, 16  ;;  %s538_s3 = scalar_lea.hbm %s816_s2, 32 }
 0x240   : > { %p535_p9 = scmp.ne.s32.totalorder %s765_s17, %s534_s29  ;;  %p539_p6 = scmp.lt.s32.totalorder %s765_s17, %s816_s2 }
 0x241   : > { %p540_p13 = scmp.lt.s32.totalorder %s538_s3, %s534_s29 }
 0x242   : > { %p536_p10 = pnand %p535_p9, %p827_p3 }
 0x243   : > { %p541_p0 = por %p540_p13, %p539_p6 }
 0x244   : > { %p537_p12 = pneg %p536_p10 }
 0x246   : > { %p542_p2 = pnand %p541_p0, %p537_p12 }
 0x248   : > { %545 = shalt.err (!%p542_p2)
}
 0x249   : > { %407 = dma.vmem_to_hbm [thread:$0]  (%p827_p3), %s302_s7, 16, %s765_s17, %s289_s20  }
 0x24a PF: > { %s313_s5 = sand.u32 1, %s593_s9   ;;  %p828_p5 = scmp.ne.s32.totalorder %s822_s26, 0 }
 0x24b   : > { %p829_p8 = scmp.ge.s32.totalorder %s621_s16, 2  ;;  %s314_s6 = scalar_lea.sflag [#allocation5], %s313_s5 }
 0x24d   : > { %p414_p4 = pnand %p829_p8, %p828_p5 }
 0x24f   : > { %p415_p11 = pneg %p414_p4 }
 0x251   : > { %587 = dma.done.wait (%p415_p11), %s314_s6, 16  }
 0x252   : > { %589 = vsyncadd (%p415_p11), %s314_s6, 4294967280  ;;  %s18_s16 = sadd.s32 1, %s621_s16   ;;  %s830_s9 = smov %s597_s10 }
 0x253   : > { %p15_p1 = scmp.ge.s32.totalorder %s18_s16, 4   ;;  %s831_s10 = smov %s601_s11 }
 0x254   : > { %s832_s11 = smov %s699_s24  ;;  %s833_s12 = smov %s609_s13 }
 0x255   : > { %s804_s13 = smov 0   ;;  %s834_s14 = smov %s617_s15 }
 0x256   : > { %s835_s15 = smov %s837_s19  ;;  %17 = sbr.rel (!%p15_p1) target bundleno = 7 (0x7), region = 92 }
 0x25b   :  { %318 = vsyncpa [#allocation4], 1 }
 0x25c   :  { %320 = vsyncpa [#allocation4 + $0x1], 1 }
 0x25d   :  { %321 = vsyncpa [#allocation5], 1 }
 0x25e   :  { %323 = vsyncpa [#allocation5 + $0x1], 1 }

</bundles_post_ra>
